<compile_context>
chip_gen: v5e
topology: v5e:2x2
jax: 0.10.0
libtpu: 0.0.40
codegen_flags: <defaults>
</compile_context>

<pallas_src>
import functools

import jax
import jax.numpy as jnp
from jax.experimental import pallas as pl
from jax.experimental.pallas import tpu as pltpu

TAU = 100.0
EPS = 1e-6


def _round_up(x, m):
    return (x + m - 1) // m * m


# ---------------------------------------------------------------------------
# L2 normalization (torch: a / max(||a||_2, eps)), hoisted out of the main grid
# ---------------------------------------------------------------------------
def _l2norm_kernel(x_ref, o_ref):
    x = x_ref[...].astype(jnp.float32)
    n2 = jnp.sum(x * x, axis=-1, keepdims=True)
    # rsqrt(max(n2, eps^2)) == 1 / max(sqrt(n2), eps); routed to the EUP.
    inv = jax.lax.rsqrt(jnp.maximum(n2, jnp.float32(EPS * EPS)))
    o_ref[...] = (x * inv).astype(o_ref.dtype)


def _l2norm(x, block_rows, out_dtype):
    n, s, d = x.shape
    assert n % block_rows == 0
    return pl.pallas_call(
        _l2norm_kernel,
        out_shape=jax.ShapeDtypeStruct((n, s, d), out_dtype),
        grid_spec=pltpu.PrefetchScalarGridSpec(
            num_scalar_prefetch=0,
            grid=(n // block_rows,),
            in_specs=[pl.BlockSpec((block_rows, s, d), lambda i: (i, 0, 0))],
            out_specs=pl.BlockSpec((block_rows, s, d), lambda i: (i, 0, 0)),
        ),
        compiler_params=pltpu.CompilerParams(
            dimension_semantics=("parallel",)),
    )(x)


# ---------------------------------------------------------------------------
# Main DCM kernel: one lane-dense (ta, tb) tile of retrieve_logits per step
# ---------------------------------------------------------------------------
def dcm_kernel(text_ref, mask_ref, video_ref, out_ref, *, tau):
    # text_ref : (TA, T, D)  L2-normalized text tokens  (bf16/f32)
    # mask_ref : (TA, T, 1)  token mask (f32, 0/1)
    # video_ref: (TB, V, D)  L2-normalized video frames (bf16/f32)
    # out_ref  : (TA, TB)    retrieve_logits tile (f32)
    TA, T, D = text_ref.shape
    TB, V, _ = video_ref.shape
    M, N = TA * T, TB * V
    f32 = jnp.float32
    neg_inf = f32(-jnp.inf)
    tauf = f32(tau)

    t_all = text_ref[...]                                     # (TA, T, D)
    mask3 = mask_ref[...]                                     # (TA, T, 1) f32
    t_flat = t_all.reshape(M, D)
    # Mask folded into a third matmul (mask is 0/1 -> exact), which gives the
    # masked logits directly in video-major layout without any lane-oriented
    # mask broadcast.
    tm_flat = (t_all * mask3.astype(t_all.dtype)).reshape(M, D)
    v_flat = video_ref[...].reshape(N, D)

    dn = (((1,), (1,)), ((), ()))
    raw_T = jax.lax.dot_general(t_flat, v_flat, dn,
                                preferred_element_type=f32)   # (M, N)
    raw_V = jax.lax.dot_general(v_flat, t_flat, dn,
                                preferred_element_type=f32)   # (N, M)
    msk_V = jax.lax.dot_general(v_flat, tm_flat, dn,
                                preferred_element_type=f32)   # (N, M) masked

    # ---- stage-1 frame softmax (over v), video-major: exact segment max is a
    #      cheap 8-sublane reduce; normalization folded into the reduction ----
    r3v = raw_V.reshape(TB, V, M)
    s3v = msk_V.reshape(TB, V, M) * tauf
    mx1 = jnp.max(s3v, axis=1, keepdims=True)                 # (TB, 1, M)
    e1 = jnp.exp(s3v - mx1)                                   # (TB, V, M)
    t2v_bm = jnp.sum(e1 * r3v, axis=1) / jnp.sum(e1, axis=1)  # (TB, M)

    # ---- stage-1 token softmax (over t), text-major ----
    r3t = raw_T.reshape(TA, T, N)
    lm_t = r3t * mask3                                        # masked logits
    st_t = jnp.where(lm_t == 0.0, neg_inf, lm_t) * tauf       # torch semantics
    mx2 = jnp.max(st_t, axis=1, keepdims=True)                # (TA, 1, N)
    e2 = jnp.exp(st_t - mx2)                                  # (TA, T, N)
    v2t = jnp.sum(e2 * r3t, axis=1) / jnp.sum(e2, axis=1)     # (TA, N)

    # Block-diagonal ones matrix: segment sums over v become MXU matmuls.
    seg = jax.lax.broadcasted_iota(jnp.int32, (N, TB), 0) // V
    col = jax.lax.broadcasted_iota(jnp.int32, (N, TB), 1)
    S = (seg == col).astype(f32)                              # (N, TB)

    # ---- stage-2 token softmax over t (text-major; exact segment max) ----
    t2v3 = jnp.transpose(t2v_bm).reshape(TA, T, TB)           # (TA, T, TB)
    g_t = jnp.where(t2v3 == 0.0, neg_inf, t2v3) * tauf
    et = jnp.exp(g_t - jnp.max(g_t, axis=1, keepdims=True))   # unnormalized
    Dt = jnp.sum(et, axis=1)                                  # (TA, TB)

    # ---- stage-2 frame softmax over v (text-major) ----
    # Shift = per-row max over all (b, v): exact softmax shift (shift-invariant),
    # cheap, overflow-free.  TODO(synk): pathologically spread similarities
    # (>0.87 cosine gap between videos) could underflow this shift.
    g_v = v2t * tauf                                          # (TA, N)
    ev = jnp.exp(g_v - jnp.max(g_v, axis=-1, keepdims=True))  # unnormalized
    Dv = jax.lax.dot_general(ev, S, (((1,), (0,)), ((), ())),
                             preferred_element_type=f32)      # (TA, TB)

    # ---- final bilinear contraction ----
    # out[a,b] = sum_t et[a,t,b] * (sum_v ev[a,(b,v)] * raw[a,t,(b,v)]) / (Dt*Dv)
    prod = (r3t * ev[:, None, :]).reshape(M, N)
    Q = jax.lax.dot_general(prod, S, (((1,), (0,)), ((), ())),
                            preferred_element_type=f32).reshape(TA, T, TB)
    G = jnp.sum(et * Q, axis=1)                               # (TA, TB)
    out = G * pl.reciprocal(Dt * Dv, approx=True)             # EUP reciprocal
    out_ref[...] = out.astype(out_ref.dtype)                  # one dense store


def dcm_forward(text_feat, video_feat, text_mask, tau=TAU, ta=None, tb=None,
                feature_dtype=jnp.bfloat16):
    """Pallas DCM forward. Returns retrieve_logits of shape (A, B), float32."""
    # torch: if len(text_mask.size()) >= 3: flatten leading dims
    if text_mask.ndim >= 3:
        text_mask = text_mask.reshape((-1,) + text_mask.shape[2:])
    A, T, D = text_feat.shape
    B, V, Dv = video_feat.shape
    assert D == Dv and text_mask.shape == (A, T)
    # Fast path assumes T, V multiples of 8 (sublane tile); other sizes would
    # need Mosaic relayouts / frame-padding with an explicit frame mask.
    # TODO(synk): V not a multiple of 8 would need padded-frame masking in the
    # two frame softmaxes; not implemented.

    # --- tile selection ---
    # tb: lane-dense (multiple-of-128) output blocks when B is large (B is
    # zero-padded up; padded columns are NaN and sliced off), whole B otherwise.
    if tb is None:
        tb = 128 if B >= 128 else B
    B_pad = _round_up(B, tb)
    # ta: big tiles cut repeated video HBM traffic (v5e), but keep >=4 grid
    # steps so v7x's two TensorCores and the pipeline have work to overlap.
    if ta is None:
        ta = 64
        while ta > 8 and (_round_up(A, ta) // ta) * (B_pad // tb) < 4:
            ta //= 2
    A_pad = _round_up(A, ta)
    assert ta % 8 == 0 and tb >= 1 and A_pad % ta == 0 and B_pad % tb == 0

    mask_f = text_mask.astype(jnp.float32)
    if A_pad != A:
        text_feat = jnp.pad(text_feat, ((0, A_pad - A), (0, 0), (0, 0)))
        mask_f = jnp.pad(mask_f, ((0, A_pad - A), (0, 0)))
    if B_pad != B:
        video_feat = jnp.pad(video_feat, ((0, B_pad - B), (0, 0), (0, 0)))

    # Hoisted L2 normalization (done once, not once per grid step); emits
    # bf16 by default -> full-rate MXU matmuls and half the DMA bytes.
    text_n = _l2norm(text_feat, ta, feature_dtype)
    video_n = _l2norm(video_feat, tb, feature_dtype)
    mask3 = mask_f.reshape(A_pad, T, 1)

    grid_a, grid_b = A_pad // ta, B_pad // tb
    isz = jnp.dtype(feature_dtype).itemsize
    cost = pl.CostEstimate(
        flops=int(A_pad * B_pad * T * V * (6 * D + 2 * tb)
                  + 4 * A_pad * B_pad * (T * V + T + V)),
        transcendentals=int(A_pad * B_pad * (2 * T * V + T + V)),
        bytes_accessed=int(A_pad * T * D * isz * grid_b
                           + B_pad * V * D * isz * grid_a
                           + A_pad * T * 4 * grid_b + A_pad * B_pad * 4),
    )

    # NOTE: the torch chunking loop (samples_per_batch=1000) is an identity
    # split/concat; the grid over A plays the same role here.
    out = pl.pallas_call(
        functools.partial(dcm_kernel, tau=float(tau)),
        out_shape=jax.ShapeDtypeStruct((A_pad, B_pad), jnp.float32),
        grid_spec=pltpu.PrefetchScalarGridSpec(
            num_scalar_prefetch=0,
            grid=(grid_a, grid_b),           # ib innermost: text not re-fetched
            in_specs=[
                pl.BlockSpec((ta, T, D), lambda ia, ib: (ia, 0, 0)),
                pl.BlockSpec((ta, T, 1), lambda ia, ib: (ia, 0, 0)),
                pl.BlockSpec((tb, V, D), lambda ia, ib: (ib, 0, 0)),
            ],
            out_specs=pl.BlockSpec((ta, tb), lambda ia, ib: (ia, ib)),
        ),
        compiler_params=pltpu.CompilerParams(
            dimension_semantics=("parallel", "parallel"),
            # Actual need is a few MiB; keep well under v7x's 64 MiB physical.
            vmem_limit_bytes=32 * 1024 * 1024),
        cost_estimate=cost,
    )(text_n, mask3, video_n)
    return out[:A, :B]


# ---------------------------------------------------------------------------
# Pure-JAX reference mirroring the PyTorch forward (communication=False)
# ---------------------------------------------------------------------------
def dcm_reference(text_feat, video_feat, text_mask, tau=TAU):
    if text_mask.ndim >= 3:
        text_mask = text_mask.reshape((-1,) + text_mask.shape[2:])
    hi = jax.lax.Precision.HIGHEST

    def norm(a, eps=EPS):
        n = jnp.sqrt(jnp.sum(a * a, axis=-1, keepdims=True))
        return a / jnp.maximum(n, eps)

    t = norm(text_feat.astype(jnp.float32))
    v = norm(video_feat.astype(jnp.float32))
    mask = text_mask.astype(jnp.float32)
    logits = jnp.einsum('atd,bvd->abtv', t, v, precision=hi)
    logits = logits * mask[:, None, :, None]
    vps1 = jax.nn.softmax(logits * tau, axis=-1)
    tf1 = jnp.einsum('abtv,bvd->abtd', vps1, v, precision=hi)
    t2v = jnp.einsum('abtd,atd->abt', tf1, t, precision=hi)
    tps1 = jax.nn.softmax(jnp.where(logits == 0, -jnp.inf, logits) * tau, axis=-2)
    vf1 = jnp.einsum('abtv,atd->abvd', tps1, t, precision=hi)
    v2t = jnp.einsum('abvd,bvd->abv', vf1, v, precision=hi)
    tps2 = jax.nn.softmax(jnp.where(t2v == 0, -jnp.inf, t2v) * tau, axis=-1)
    vf2 = jnp.einsum('abt,atd->abd', tps2, t, precision=hi)
    vps2 = jax.nn.softmax(v2t * tau, axis=-1)
    tf2 = jnp.einsum('abv,bvd->abd', vps2, v, precision=hi)
    return jnp.einsum('abd,abd->ab', vf2, tf2, precision=hi)


if __name__ == "__main__":
    A, B, T, V, D = 64, 8, 8, 8, 128

    key = jax.random.PRNGKey(0)
    k1, k2 = jax.random.split(key)
    text_feat = jax.random.normal(k1, (A, T, D), dtype=jnp.float32)
    video_feat = jax.random.normal(k2, (B, V, D), dtype=jnp.float32)
    # Per-sample valid token lengths in {4..7}: exercises the padded-token path.
    lengths = 4 + (jnp.arange(A) % 4)
    text_mask = (jnp.arange(T)[None, :] < lengths[:, None]).astype(jnp.float32)

    ref = jax.block_until_ready(dcm_reference(text_feat, video_feat, text_mask))

    # Exact-dtype path: f32 features, tight tolerance against the reference.
    out_f32 = jax.block_until_ready(
        dcm_forward(text_feat, video_feat, text_mask,
                    feature_dtype=jnp.float32))
    assert out_f32.shape == (A, B), out_f32.shape
    assert jnp.allclose(out_f32, ref, rtol=5e-3, atol=5e-3), (
        float(jnp.max(jnp.abs(out_f32 - ref))))

    # Default fast path: bf16 normalized features.  tau=100 amplifies the bf16
    # quantization of the similarities, so only a loose sanity check here.
    out_bf16 = jax.block_until_ready(
        dcm_forward(text_feat, video_feat, text_mask))
    assert out_bf16.shape == (A, B), out_bf16.shape
    assert jnp.allclose(out_bf16, ref, rtol=5e-2, atol=5e-2), (
        float(jnp.max(jnp.abs(out_bf16 - ref))))

    print("KERNEL_OK")
</pallas_src>

<mosaic_0001>
module attributes {stable_mosaic.version = 11 : i64} {
  func.func @_l2norm_kernel(%arg0: i32, %arg1: memref<16x8x128xf32, #tpu.memory_space<vmem>>, %arg2: memref<16x8x128xf32, #tpu.memory_space<vmem>>) attributes {dimension_semantics = [#tpu.dimension_semantics<parallel>], iteration_bounds = array<i64: 4>, scalar_prefetch = 0 : i64, scratch_operands = 0 : i64, tpu.core_type = #tpu.core_type<tc>, window_params = [{transform_indices = @transform_0, window_bounds = array<i64: 16, 8, 128>}, {transform_indices = @transform_1, window_bounds = array<i64: 16, 8, 128>}]} {
    %c0 = arith.constant 0 : index
    %c0_0 = arith.constant 0 : index
    %c0_1 = arith.constant 0 : index
    %0 = vector.load %arg1[%c0, %c0_0, %c0_1] : memref<16x8x128xf32, #tpu.memory_space<vmem>>, vector<16x8x128xf32>
    %1 = arith.mulf %0, %0 : vector<16x8x128xf32>
    %cst = arith.constant dense<0.000000e+00> : vector<16x8xf32>
    %2 = vector.multi_reduction <add>, %1, %cst [2] : vector<16x8x128xf32> to vector<16x8xf32>
    %3 = vector.shape_cast %2 : vector<16x8xf32> to vector<16x8x1xf32>
    %cst_2 = arith.constant 9.99999996E-13 : f32
    %4 = vector.broadcast %cst_2 : f32 to vector<16x8x1xf32>
    %5 = arith.maximumf %3, %4 : vector<16x8x1xf32>
    %6 = math.rsqrt %5 : vector<16x8x1xf32>
    %7 = vector.broadcast %6 : vector<16x8x1xf32> to vector<16x8x128xf32>
    %8 = arith.mulf %0, %7 : vector<16x8x128xf32>
    %c0_3 = arith.constant 0 : index
    %c0_4 = arith.constant 0 : index
    %c0_5 = arith.constant 0 : index
    %9 = vector.load %arg2[%c0_3, %c0_4, %c0_5] : memref<16x8x128xf32, #tpu.memory_space<vmem>>, vector<16x8x128xf32>
    tpu.vector_store %arg2[%c0_3, %c0_4, %c0_5], %8 {strides = array<i32>} : memref<16x8x128xf32, #tpu.memory_space<vmem>>, vector<16x8x128xf32>,
    return
  }
  func.func @transform_0(%arg0: i32) -> (i32, i32, i32) {
    %c0_i32 = arith.constant 0 : i32
    %c0_i32_0 = arith.constant 0 : i32
    %c0_i32_1 = arith.constant 0 : i32
    return %arg0, %c0_i32, %c0_i32_0 : i32, i32, i32
  }
  func.func @transform_1(%arg0: i32) -> (i32, i32, i32) {
    %c0_i32 = arith.constant 0 : i32
    %c0_i32_0 = arith.constant 0 : i32
    %c0_i32_1 = arith.constant 0 : i32
    return %arg0, %c0_i32, %c0_i32_0 : i32, i32, i32
  }
}

</mosaic_0001>

<bundles_post_ra>
// kernel: tpu_custom_call.1
= control target key start
LH: loop header
LB: loop body
LE: loop exit
PB: predicated region body
PF: predicated region fallthrough
CT: control target
= control target key end

     0   :  { %6 = vsyncpa [#allocation3], 0  ;;  %s1074_s0 = inlined_call_operand.hbm [shape: f32[64,8,128], index: 0, kind: input, shape index: {}]   ;;  %s1075_s1 = inlined_call_operand.hbm [shape: f32[64,8,128], index: 1, kind: output, shape index: {}]  }
   0x1   :  { %8 = vsyncpa [#allocation3 + $0x1], 0 }
   0x2   :  { %9 = vsyncpa [#allocation4], 0 }
   0x3   :  { %11 = vsyncpa [#allocation4 + $0x1], 0  ;;  %s710_s6 = smov 0   ;;  %s712_s7 = smov 0  }
   0x4   :  { %s714_s8 = smov 0   ;;  %s716_s9 = smov 0  }
   0x5 LB: > { %s731_s10 = sadd.s32 4294967295, %s694_s9   ;;  %s500_s11 = sadd.s32 4294967294, %s694_s9   ;;  %s694_s9 = sphi %s716_s9, %s1084_s9   ;;  %s690_s8 = sphi %s714_s8, %s1083_s8   ;;  %s686_s7 = sphi %s712_s7, %s1082_s7   ;;  %s682_s6 = sphi %s710_s6, %s1081_s6  }
   0x6   : > { %s735_s12 = sadd.s32 1, %s694_s9   ;;  %s24_s13 = sadd.s32 1, %s690_s8 }
   0x7   : > { %s21_s14 = ssub.s32 %s694_s9, %s735_s12  ;;  %p31_p0 = scmp.ne.s32.totalorder %s690_s8, %s686_s7 }
   0x8   : > { %p22_p1 = scmp.eq.s32.totalorder %s21_s14, 0  ;;  %p32_p2 = scmp.eq.s32.totalorder %s694_s9, 0 }
   0x9   : > { %p37_p3 = scmp.ne.s32.totalorder %s686_s7, %s682_s6  ;;  %p38_p4 = scmp.eq.s32.totalorder %s731_s10, 0 }
   0xa   : > { %s747_s15 = scalar_select %p22_p1, %s690_s8, %s24_s13  }
   0xb   : > { %p749_p5 = por %p32_p2, %p31_p0  ;;  %p753_p6 = por %p38_p4, %p37_p3 }
   0xc   : > { %p61_p7 = scmp.eq.s32.totalorder %s731_s10, 3  ;;  %p67_p8 = scmp.eq.s32.totalorder %s500_s11, 3 }
   0xd   : > { %p528_p9 = scmp.lt.s32.totalorder %s694_s9, 4  ;;  %s87_s20 = sand.u32 1, %s690_s8  }
   0xe   : > { %p759_p10 = por %p61_p7, %p31_p0  ;;  %p763_p11 = por %p67_p8, %p37_p3 }
   0xf   : > { %s514_s21 = sshll.u32 %s694_s9, 7  ;;  %s503_s22 = sshll.u32 %s87_s20, 7 }
  0x10   : > { %s96_s25 = scalar_lea.hbm %s1074_s0, %s514_s21  ;;  %s91_s27 = scalar_lea.vmem [#allocation2], %s503_s22 }
  0x11   : > { %s97_s26 = sshll.u32 %s96_s25, 4  ;;  %s99_s28 = sshll.u32 %s91_s27, 4  ;;  %s98_s26 = int_to_ptr.hbm [resolvable:$true] %s97_s26  ;;  %s100_s28 = int_to_ptr.vmem [resolvable:$true] %s99_s28 }
  0x12   : > { %p774_p12 = pnand %p528_p9, %p749_p5  ;;  %p506_p13 = scmp.ge.s32.totalorder %s694_s9, 1 }
  0x13   : > { %p107_p0 = scmp.lt.s32.totalorder %s694_s9, 5  ;;  %s88_s30 = scalar_lea.sflag [#allocation3], %s87_s20 }
  0x14   : > { %s598_s2 = sshra.s32 %s98_s26, 4  ;;  %p602_p2 = pneg %p774_p12  ;;  %s599_s2 = int_to_ptr.hbm [resolvable:$true] %s598_s2 }
  0x15   : > { %s600_s3 = scalar_lea.hbm %s599_s2, 128  ;;  %s605_s11 = scalar_lea.hbm %s1074_s0, 512 }
  0x16   : > { %p601_p1 = scmp.ne.s32.totalorder %s599_s2, %s600_s3  ;;  %p606_p5 = scmp.lt.s32.totalorder %s599_s2, %s1074_s0 }
  0x17   : > { %p607_p7 = scmp.lt.s32.totalorder %s605_s11, %s600_s3 }
  0x18   : > { %p603_p3 = pnand %p602_p2, %p601_p1 }
  0x19   : > { %p608_p8 = por %p607_p7, %p606_p5 }
  0x1a   : > { %p604_p4 = pneg %p603_p3 }
  0x1c   : > { %p609_p9 = pnand %p608_p8, %p604_p4 }
  0x1e   : > { %612 = shalt.err (!%p609_p9)
}
  0x1f   : > { %s696_s16 = smov 128   ;;  %s697_s20 = smov 8  }
  0x20   : > { %523 = dma.hbm_to_vmem [thread:$0]  (!%p774_p12), %s98_s26, 2048, %s100_s28, %s88_s30, %s696_s16, %s696_s16, %s697_s20  }
  0x21   : > { %p108_p1 = pnand %p506_p13, %p107_p0 }
  0x22   : > { %s795_s21 = sand.u32 (!%p108_p1), 1, %s686_s7  }
  0x23   : > { %111 = sbr.rel (%p108_p1) target bundleno = 227 (0xe3), region = 24  ;;  %s507_s22 = sshll.u32 (!%p108_p1), %s795_s21, 7 }
  0x24   : > { %s114_s23 = scalar_lea.sflag (!%p108_p1), [#allocation3], %s795_s21  ;;  %s801_s24 = scalar_lea.vmem (!%p108_p1), [#allocation2], %s507_s22 }
  0x28   : > { %673 = dma.done.wait (%p753_p6), %s114_s23, 2048  }
  0x29   : > { %675 = vsyncadd (%p753_p6), %s114_s23, 4294965248  ;;  %v808_v0 = vld [vmem:[%s801_s24 + $0x20] sm:$0xff]  ;;  %v811_v1 = vld [vmem:[%s801_s24 + $0x10] sm:$0xff]  ;;  %s927_s17 = scalar_lea.vmem [#allocation5], %s507_s22  ;;  %s515_s25 = sshll.u32 %s731_s10, 7 }
  0x2a   : > { %v814_v2 = vld [vmem:[%s801_s24] sm:$0xff]  ;;  %v159_v3 = vmul.f32 %v808_v0, %v808_v0  ;;  %v157_v4 = vmul.f32 %v811_v1, %v811_v1  ;;  %v823_v6 = vld [vmem:[%s801_s24 + $0x28] sm:$0xff]  ;;  %v826_v7 = vld [vmem:[%s801_s24 + $0x18] sm:$0xff]  ;;  %s423_s28 = scalar_lea.hbm %s1075_s1, %s515_s25  ;;  %s424_s10 = sshll.u32 %s927_s17, 4  ;;  %s425_s10 = int_to_ptr.vmem [resolvable:$true] %s424_s10 }
  0x2b   : > { %v155_v5 = vmul.f32 %v814_v2, %v814_v2  ;;  %v829_v8 = vld [vmem:[%s801_s24 + $0x8] sm:$0xff]  ;;  %v160_v9 = vmul.f32 %v823_v6, %v823_v6  ;;  %v158_v10 = vmul.f32 %v826_v7, %v826_v7  ;;  %v838_v12 = vld [vmem:[%s801_s24 + $0x40] sm:$0xff]  ;;  %v841_v13 = vld [vmem:[%s801_s24 + $0x38] sm:$0xff]  ;;  %s426_s29 = sshll.u32 %s423_s28, 4  ;;  %s412_s30 = scalar_lea.sflag [#allocation4], %s795_s21  ;;  %s427_s29 = int_to_ptr.hbm [resolvable:$true] %s426_s29 }
  0x2c   : > { %179 = vadd.xlane.f32.xlu2 %v159_v3  ;;  %175 = vadd.xlane.f32.xlu1 %v157_v4  ;;  %v156_v11 = vmul.f32 %v829_v8, %v829_v8  ;;  %v844_v14 = vld [vmem:[%s801_s24 + $0x30] sm:$0xff]  ;;  %v163_v15 = vmul.f32 %v838_v12, %v838_v12  ;;  %v162_v16 = vmul.f32 %v841_v13, %v841_v13  ;;  %v853_v18 = vld [vmem:[%s801_s24 + $0x58] sm:$0xff]  ;;  %v859_v20 = vld [vmem:[%s801_s24 + $0x48] sm:$0xff]  ;;  %s642_s2 = sshra.s32 %s427_s29, 4  ;;  %s648_s11 = scalar_lea.hbm %s1075_s1, 512  ;;  %s643_s2 = int_to_ptr.hbm [resolvable:$true] %s642_s2 }
  0x2d   : > { %171 = vadd.xlane.f32.xlu0 %v155_v5  ;;  %v161_v17 = vmul.f32 %v844_v14, %v844_v14  ;;  %v856_v19 = vld [vmem:[%s801_s24 + $0x50] sm:$0xff]  ;;  %v166_v21 = vmul.f32 %v853_v18, %v853_v18  ;;  %v164_v23 = vmul.f32 %v859_v20, %v859_v20  ;;  %v871_v25 = vld [vmem:[%s801_s24 + $0x68] sm:$0xff]  ;;  %v874_v26 = vld [vmem:[%s801_s24 + $0x60] sm:$0xff]  ;;  %s644_s3 = scalar_lea.hbm %s643_s2, 128  ;;  %p649_p0 = scmp.lt.s32.totalorder %s643_s2, %s1075_s1 }
  0x2e   : > { %v165_v22 = vmul.f32 %v856_v19, %v856_v19  ;;  %v868_v24 = vld [vmem:[%s801_s24 + $0x70] sm:$0xff]  ;;  %v168_v28 = vmul.f32 %v871_v25, %v871_v25  ;;  %v167_v29 = vmul.f32 %v874_v26, %v874_v26  ;;  %v883_v30 = vld [vmem:[%s801_s24 + $0x78] sm:$0xff]  ;;  %p645_p6 = scmp.ne.s32.totalorder %s643_s2, %s644_s3  ;;  %p650_p2 = scmp.lt.s32.totalorder %s648_s11, %s644_s3 }
  0x2f   : > { %v169_v27 = vmul.f32 %v868_v24, %v868_v24  ;;  %v170_v31 = vmul.f32 %v883_v30, %v883_v30 }
  0x30   : > { %p646_p12 = pnand %p645_p6, %p759_p10  ;;  %p651_p3 = por %p650_p2, %p649_p0 }
  0x32   : > { %p647_p13 = pneg %p646_p12 }
  0x34   : > { %181 = vadd.xlane.f32.xlu2 %v160_v9  ;;  %177 = vadd.xlane.f32.xlu1 %v158_v10  ;;  %p652_p4 = pnand %p651_p3, %p647_p13 }
  0x35   : > { %173 = vadd.xlane.f32.xlu0 %v156_v11 }
  0x3c   : > { %187 = vadd.xlane.f32.xlu2 %v163_v15  ;;  %185 = vadd.xlane.f32.xlu1 %v162_v16 }
  0x3d   : > { %183 = vadd.xlane.f32.xlu0 %v161_v17 }
  0x44   : > { %193 = vadd.xlane.f32.xlu2 %v166_v21  ;;  %191 = vadd.xlane.f32.xlu1 %v165_v22 }
  0x45   : > { %189 = vadd.xlane.f32.xlu0 %v164_v23 }
  0x4c   : > { %199 = vadd.xlane.f32.xlu2 %v169_v27  ;;  %197 = vadd.xlane.f32.xlu1 %v168_v28 }
  0x4d   : > { %195 = vadd.xlane.f32.xlu0 %v167_v29 }
  0x55   : > { %201 = vadd.xlane.f32.xlu0 %v170_v31 }
  0x9f   : > { %v180_v32 = vpop.xlane.xlu2 %179  ;;  %v176_v33 = vpop.xlane.xlu1 %175 }
  0xa0   : > { %v207_v34 = vmax.f32 %v180_v32, 1e-12  ;;  %v205_v35 = vmax.f32 %v176_v33, 1e-12  ;;  %v172_v36 = vpop.xlane.xlu0 %171 }
  0xa1   : > { %v203_v37 = vmax.f32 %v172_v36, 1e-12 }
  0xa2   : > { %566 = vrsqrt.f32 %v207_v34  ;;  %vm265_vm0 = vweird.f32 %v207_v34  ;;  %vm245_vm2 = vweird.f32 %v205_v35 }
  0xa3   : > { %568 = vrsqrt.f32 %v205_v35  ;;  %vm225_vm4 = vweird.f32 %v203_v37 }
  0xa4   : > { %570 = vrsqrt.f32 %v203_v37 }
  0xa7   : > { %v182_v38 = vpop.xlane.xlu2 %181  ;;  %v178_v39 = vpop.xlane.xlu1 %177 }
  0xa8   : > { %v567_v40 = vpop.eup %566  ;;  %v887_v41 = vmax.f32 %v182_v38, 1e-12  ;;  %v889_v42 = vmax.f32 %v178_v39, 1e-12  ;;  %v174_v43 = vpop.xlane.xlu0 %173 }
  0xa9   : > { %v569_v44 = vpop.eup %568  ;;  %v260_v45 = vmul.f32 %v567_v40, %v207_v34  ;;  %v891_v46 = vmax.f32 %v174_v43, 1e-12  ;;  %vm266_vm1 = vweird.f32 %v567_v40 }
  0xaa   : > { %v571_v47 = vpop.eup %570  ;;  %v240_v48 = vmul.f32 %v569_v44, %v205_v35  ;;  %572 = vrsqrt.f32 %v887_v41  ;;  %vm246_vm3 = vweird.f32 %v569_v44  ;;  %vm267_vm6 = vmor %vm265_vm0, %vm266_vm1  ;;  %vm275_vm9 = vweird.f32 %v887_v41 }
  0xab   : > { %v261_v49 = vmul.f32 %v567_v40, %v260_v45  ;;  %v220_v50 = vmul.f32 %v571_v47, %v203_v37  ;;  %574 = vrsqrt.f32 %v889_v42  ;;  %vm226_vm5 = vweird.f32 %v571_v47  ;;  %vm247_vm7 = vmor %vm245_vm2, %vm246_vm3 }
  0xac   : > { %v241_v51 = vmul.f32 %v569_v44, %v240_v48  ;;  %576 = vrsqrt.f32 %v891_v46  ;;  %vm227_vm8 = vmor %vm225_vm4, %vm226_vm5  ;;  %vm255_vm10 = vweird.f32 %v889_v42  ;;  %vm235_vm15 = vweird.f32 %v891_v46 }
  0xad   : > { %v262_v52 = vmul.f32 0.5, %v261_v49  ;;  %v221_v53 = vmul.f32 %v571_v47, %v220_v50 }
  0xae   : > { %v242_v54 = vmul.f32 0.5, %v241_v51 }
  0xaf   : > { %v263_v55 = vsub.f32 1.5, %v262_v52  ;;  %v222_v56 = vmul.f32 0.5, %v221_v53  ;;  %v188_v57 = vpop.xlane.xlu2 %187  ;;  %v186_v58 = vpop.xlane.xlu1 %185 }
  0xb0   : > { %v896_v59 = vpop.eup %572  ;;  %v243_v60 = vsub.f32 1.5, %v242_v54  ;;  %v898_v61 = vmax.f32 %v188_v57, 1e-12  ;;  %v184_v62 = vpop.xlane.xlu0 %183  ;;  %v911_v15 = vmax.f32 %v186_v58, 1e-12 }
  0xb1   : > { %v900_v63 = vpop.eup %574  ;;  %v264_v3 = vmul.f32 %v567_v40, %v263_v55  ;;  %v223_v4 = vsub.f32 1.5, %v222_v56  ;;  %v270_v5 = vmul.f32 %v896_v59, %v887_v41  ;;  %vm276_vm11 = vweird.f32 %v896_v59 }
  0xb2   : > { %v904_v9 = vpop.eup %576  ;;  %v244_v10 = vmul.f32 %v569_v44, %v243_v60  ;;  %v250_v11 = vmul.f32 %v900_v63, %v889_v42  ;;  %578 = vrsqrt.f32 %v898_v61  ;;  %v935_v36 = vmax.f32 %v184_v62, 1e-12  ;;  %vm277_vm14 = vmor %vm275_vm9, %vm276_vm11 }
  0xb3   : > { %v268_v16 = vsel %vm267_vm6, %v567_v40, %v264_v3  ;;  %v224_v17 = vmul.f32 %v571_v47, %v223_v4  ;;  %v271_v21 = vmul.f32 %v896_v59, %v270_v5  ;;  %v230_v22 = vmul.f32 %v904_v9, %v891_v46 }
  0xb4   : > { %v383_v23 = vmul.f32 %v268_v16, %v808_v0  ;;  %v248_v27 = vsel %vm247_vm7, %v569_v44, %v244_v10  ;;  %v251_v28 = vmul.f32 %v900_v63, %v250_v11  ;;  %580 = vrsqrt.f32 %v911_v15 }
  0xb5   : > { %v381_v29 = vmul.f32 %v248_v27, %v811_v1  ;;  %v228_v31 = vsel %vm227_vm8, %v571_v47, %v224_v17  ;;  %v272_v32 = vmul.f32 0.5, %v271_v21  ;;  %v231_v33 = vmul.f32 %v904_v9, %v230_v22 }
  0xb6   : > { %399 = vst [vmem:[%s927_s17 + $0x20] sm:$0xff] %v383_v23  ;;  %v379_v0 = vmul.f32 %v228_v31, %v814_v2  ;;  %v252_v34 = vmul.f32 0.5, %v251_v28  ;;  %vm256_vm12 = vweird.f32 %v900_v63  ;;  %vm236_vm13 = vweird.f32 %v904_v9 }
  0xb7   : > { %397 = vst [vmem:[%s927_s17 + $0x10] sm:$0xff] %v381_v29  ;;  %v273_v1 = vsub.f32 1.5, %v272_v32  ;;  %v232_v35 = vmul.f32 0.5, %v231_v33  ;;  %v194_v37 = vpop.xlane.xlu2 %193  ;;  %v192_v38 = vpop.xlane.xlu1 %191  ;;  %582 = vrsqrt.f32 %v935_v36  ;;  %vm257_vm0 = vmor %vm255_vm10, %vm256_vm12  ;;  %vm305_vm2 = vweird.f32 %v898_v61 }
  0xb8   : > { %v579_v39 = vpop.eup %578  ;;  %395 = vst [vmem:[%s927_s17] sm:$0xff] %v379_v0  ;;  %v253_v40 = vsub.f32 1.5, %v252_v34  ;;  %v939_v2 = vmax.f32 %v194_v37, 1e-12  ;;  %v941_v43 = vmax.f32 %v192_v38, 1e-12  ;;  %v190_v44 = vpop.xlane.xlu0 %189  ;;  %vm237_vm1 = vmor %vm235_vm15, %vm236_vm13  ;;  %vm295_vm4 = vweird.f32 %v911_v15 }
  0xb9   : > { %v274_v45 = vmul.f32 %v896_v59, %v273_v1  ;;  %v233_v47 = vsub.f32 1.5, %v232_v35  ;;  %v300_v48 = vmul.f32 %v579_v39, %v898_v61  ;;  %v966_v58 = vmax.f32 %v190_v44, 1e-12 }
  0xba   : > { %v254_v49 = vmul.f32 %v900_v63, %v253_v40  ;;  %584 = vrsqrt.f32 %v939_v2  ;;  %v581_v41 = vpop.eup %580  ;;  %vm306_vm3 = vweird.f32 %v579_v39  ;;  %vm285_vm7 = vweird.f32 %v935_v36 }
  0xbb   : > { %v278_v50 = vsel %vm277_vm14, %v896_v59, %v274_v45  ;;  %v234_v51 = vmul.f32 %v904_v9, %v233_v47  ;;  %v301_v52 = vmul.f32 %v579_v39, %v300_v48  ;;  %586 = vrsqrt.f32 %v941_v43  ;;  %vm307_vm5 = vmor %vm305_vm2, %vm306_vm3 }
  0xbc   : > { %v384_v53 = vmul.f32 %v278_v50, %v823_v6  ;;  %v258_v54 = vsel %vm257_vm0, %v900_v63, %v254_v49  ;;  %v290_v56 = vmul.f32 %v581_v41, %v911_v15  ;;  %588 = vrsqrt.f32 %v966_v58 }
  0xbd   : > { %v382_v46 = vmul.f32 %v258_v54, %v826_v7  ;;  %v238_v42 = vsel %vm237_vm1, %v904_v9, %v234_v51  ;;  %v302_v55 = vmul.f32 0.5, %v301_v52  ;;  %v583_v63 = vpop.eup %582  ;;  %vm296_vm6 = vweird.f32 %v581_v41 }
  0xbe   : > { %400 = vst [vmem:[%s927_s17 + $0x28] sm:$0xff] %v384_v53  ;;  %v380_v57 = vmul.f32 %v238_v42, %v829_v8  ;;  %v291_v59 = vmul.f32 %v581_v41, %v290_v56  ;;  %v280_v10 = vmul.f32 %v583_v63, %v935_v36  ;;  %vm335_vm8 = vweird.f32 %v939_v2  ;;  %vm297_vm10 = vmor %vm295_vm4, %vm296_vm6 }
  0xbf   : > { %398 = vst [vmem:[%s927_s17 + $0x18] sm:$0xff] %v382_v46  ;;  %v303_v6 = vsub.f32 1.5, %v302_v55  ;;  %v200_v60 = vpop.xlane.xlu2 %199  ;;  %v198_v62 = vpop.xlane.xlu1 %197  ;;  %vm325_vm9 = vweird.f32 %v941_v43  ;;  %vm286_vm11 = vweird.f32 %v583_v63  ;;  %vm315_vm15 = vweird.f32 %v966_v58 }
  0xc0   : > { %396 = vst [vmem:[%s927_s17 + $0x8] sm:$0xff] %v380_v57  ;;  %v972_v7 = vmax.f32 %v200_v60, 1e-12  ;;  %v974_v3 = vmax.f32 %v198_v62, 1e-12  ;;  %v196_v4 = vpop.xlane.xlu0 %195  ;;  %v585_v8 = vpop.eup %584  ;;  %v292_v9 = vmul.f32 0.5, %v291_v59  ;;  %v281_v22 = vmul.f32 %v583_v63, %v280_v10  ;;  %vm287_vm14 = vmor %vm285_vm7, %vm286_vm11 }
  0xc1   : > { %v304_v5 = vmul.f32 %v579_v39, %v303_v6  ;;  %v587_v11 = vpop.eup %586  ;;  %v330_v16 = vmul.f32 %v585_v8, %v939_v2  ;;  %vm336_vm12 = vweird.f32 %v585_v8 }
  0xc2   : > { %590 = vrsqrt.f32 %v972_v7  ;;  %v293_v21 = vsub.f32 1.5, %v292_v9  ;;  %v320_v23 = vmul.f32 %v587_v11, %v941_v43  ;;  %v282_v29 = vmul.f32 0.5, %v281_v22  ;;  %v589_v32 = vpop.eup %588  ;;  %vm337_vm0 = vmor %vm335_vm8, %vm336_vm12 }
  0xc3   : > { %v308_v17 = vsel %vm307_vm5, %v579_v39, %v304_v5  ;;  %v331_v28 = vmul.f32 %v585_v8, %v330_v16  ;;  %592 = vrsqrt.f32 %v974_v3  ;;  %v310_v35 = vmul.f32 %v589_v32, %v966_v58 }
  0xc4   : > { %v387_v27 = vmul.f32 %v308_v17, %v838_v12  ;;  %v294_v61 = vmul.f32 %v581_v41, %v293_v21  ;;  %v321_v31 = vmul.f32 %v587_v11, %v320_v23  ;;  %v993_v12 = vmax.f32 %v196_v4, 1e-12 }
  0xc5   : > { %v332_v33 = vmul.f32 0.5, %v331_v28  ;;  %v283_v34 = vsub.f32 1.5, %v282_v29  ;;  %vm326_vm13 = vweird.f32 %v587_v11  ;;  %v311_v45 = vmul.f32 %v589_v32, %v310_v35 }
  0xc6   : > { %403 = vst [vmem:[%s927_s17 + $0x40] sm:$0xff] %v387_v27  ;;  %v298_v0 = vsel %vm297_vm10, %v581_v41, %v294_v61  ;;  %v322_v1 = vmul.f32 0.5, %v321_v31  ;;  %594 = vrsqrt.f32 %v993_v12  ;;  %vm327_vm1 = vmor %vm325_vm9, %vm326_vm13  ;;  %vm316_vm2 = vweird.f32 %v589_v32 }
  0xc7   : > { %v386_v38 = vmul.f32 %v298_v0, %v841_v13  ;;  %v333_v39 = vsub.f32 1.5, %v332_v33  ;;  %v284_v40 = vmul.f32 %v583_v63, %v283_v34  ;;  %v312_v52 = vmul.f32 0.5, %v311_v45  ;;  %vm317_vm5 = vmor %vm315_vm15, %vm316_vm2 }
  0xc8   : > { %v591_v37 = vpop.eup %590  ;;  %v202_v15 = vpop.xlane.xlu0 %201  ;;  %v323_v44 = vsub.f32 1.5, %v322_v1  ;;  %vm365_vm3 = vweird.f32 %v972_v7  ;;  %vm355_vm7 = vweird.f32 %v974_v3  ;;  %vm345_vm11 = vweird.f32 %v993_v12 }
  0xc9   : > { %v360_v47 = vmul.f32 %v591_v37, %v972_v7  ;;  %v593_v48 = vpop.eup %592  ;;  %402 = vst [vmem:[%s927_s17 + $0x38] sm:$0xff] %v386_v38  ;;  %v334_v49 = vmul.f32 %v585_v8, %v333_v39  ;;  %v1004_v13 = vmax.f32 %v202_v15, 1e-12  ;;  %v288_v50 = vsel %vm287_vm14, %v583_v63, %v284_v40 }
  0xca   : > { %v324_v51 = vmul.f32 %v587_v11, %v323_v44  ;;  %v385_v53 = vmul.f32 %v288_v50, %v844_v14  ;;  %v350_v36 = vmul.f32 %v593_v48, %v974_v3  ;;  %v313_v2 = vsub.f32 1.5, %v312_v52 }
  0xcb   : > { %v361_v41 = vmul.f32 %v591_v37, %v360_v47  ;;  %v338_v54 = vsel %vm337_vm0, %v585_v8, %v334_v49  ;;  %596 = vrsqrt.f32 %v1004_v13  ;;  %vm366_vm4 = vweird.f32 %v591_v37 }
  0xcc   : > { %v390_v46 = vmul.f32 %v338_v54, %v853_v18  ;;  %v328_v42 = vsel %vm327_vm1, %v587_v11, %v324_v51  ;;  %v595_v56 = vpop.eup %594  ;;  %401 = vst [vmem:[%s927_s17 + $0x30] sm:$0xff] %v385_v53  ;;  %v351_v14 = vmul.f32 %v593_v48, %v350_v36  ;;  %v314_v43 = vmul.f32 %v589_v32, %v313_v2  ;;  %vm367_vm6 = vmor %vm365_vm3, %vm366_vm4 }
  0xcd   : > { %v362_v55 = vmul.f32 0.5, %v361_v41  ;;  %v389_v57 = vmul.f32 %v328_v42, %v856_v19  ;;  %v340_v59 = vmul.f32 %v595_v56, %v993_v12  ;;  %vm356_vm8 = vweird.f32 %v593_v48 }
  0xce   : > { %406 = vst [vmem:[%s927_s17 + $0x58] sm:$0xff] %v390_v46  ;;  %v352_v18 = vmul.f32 0.5, %v351_v14  ;;  %v318_v60 = vsel %vm317_vm5, %v589_v32, %v314_v43  ;;  %vm357_vm9 = vmor %vm355_vm7, %vm356_vm8  ;;  %vm346_vm10 = vweird.f32 %v595_v56  ;;  %vm375_vm14 = vweird.f32 %v1004_v13 }
  0xcf   : > { %v363_v6 = vsub.f32 1.5, %v362_v55  ;;  %405 = vst [vmem:[%s927_s17 + $0x50] sm:$0xff] %v389_v57  ;;  %v341_v62 = vmul.f32 %v595_v56, %v340_v59  ;;  %v388_v63 = vmul.f32 %v318_v60, %v859_v20  ;;  %vm347_vm12 = vmor %vm345_vm11, %vm346_vm10 }
  0xd0   : > { %v353_v4 = vsub.f32 1.5, %v352_v18 }
  0xd1   : > { %v364_v19 = vmul.f32 %v591_v37, %v363_v6  ;;  %v342_v5 = vmul.f32 0.5, %v341_v62  ;;  %v597_v9 = vpop.eup %596  ;;  %404 = vst [vmem:[%s927_s17 + $0x48] sm:$0xff] %v388_v63 }
  0xd2   : > { %v354_v10 = vmul.f32 %v593_v48, %v353_v4  ;;  %v370_v20 = vmul.f32 %v597_v9, %v1004_v13  ;;  %vm376_vm13 = vweird.f32 %v597_v9 }
  0xd3   : > { %v368_v8 = vsel %vm367_vm6, %v591_v37, %v364_v19  ;;  %v343_v11 = vsub.f32 1.5, %v342_v5  ;;  %vm377_vm15 = vmor %vm375_vm14, %vm376_vm13 }
  0xd4   : > { %v393_v58 = vmul.f32 %v368_v8, %v868_v24  ;;  %v358_v7 = vsel %vm357_vm9, %v593_v48, %v354_v10  ;;  %v371_v17 = vmul.f32 %v597_v9, %v370_v20 }
  0xd5   : > { %v392_v3 = vmul.f32 %v358_v7, %v871_v25  ;;  %v344_v16 = vmul.f32 %v595_v56, %v343_v11 }
  0xd6   : > { %409 = vst [vmem:[%s927_s17 + $0x70] sm:$0xff] %v393_v58  ;;  %v372_v21 = vmul.f32 0.5, %v371_v17 }
  0xd7   : > { %408 = vst [vmem:[%s927_s17 + $0x68] sm:$0xff] %v392_v3  ;;  %v348_v24 = vsel %vm347_vm12, %v595_v56, %v344_v16 }
  0xd8   : > { %v391_v22 = vmul.f32 %v348_v24, %v874_v26  ;;  %v373_v23 = vsub.f32 1.5, %v372_v21 }
  0xda   : > { %407 = vst [vmem:[%s927_s17 + $0x60] sm:$0xff] %v391_v22  ;;  %v374_v25 = vmul.f32 %v597_v9, %v373_v23 }
  0xdc   : > { %v378_v27 = vsel %vm377_vm15, %v597_v9, %v374_v25 }
  0xdd   : > { %v394_v28 = vmul.f32 %v378_v27, %v883_v30 }
  0xdf   : > { %410 = vst [vmem:[%s927_s17 + $0x78] sm:$0xff] %v394_v28 }
  0xe0   : > { %655 = shalt.err (!%p652_p4)
}
  0xe1   : > { %s698_s16 = smov 128   ;;  %s699_s20 = smov 8  }
  0xe2   : > { %518 = dma.vmem_to_hbm [thread:$0]  (%p759_p10), %s425_s10, 2048, %s427_s29, %s412_s30, %s698_s16, %s698_s16, %s699_s20  }
  0xe3 PF: > { %p529_p5 = scmp.ge.s32.totalorder %s694_s9, 2  ;;  %s441_s21 = sand.u32 1, %s682_s6  }
  0xe4   : > { %s442_s22 = scalar_lea.sflag [#allocation4], %s441_s21 }
  0xe5   : > { %p525_p7 = pnand %p529_p5, %p763_p11 }
  0xe7   : > { %p526_p8 = pneg %p525_p7 }
  0xe9   : > { %677 = dma.done.wait (%p526_p8), %s442_s22, 2048  }
  0xea   : > { %679 = vsyncadd (%p526_p8), %s442_s22, 4294965248  ;;  %p14_p9 = scmp.ge.s32.totalorder %s735_s12, 6   ;;  %s1081_s6 = smov %s686_s7 }
  0xeb   : > { %s1082_s7 = smov %s690_s8  ;;  %s1083_s8 = smov %s747_s15 }
  0xec   : > { %s1084_s9 = smov %s735_s12  ;;  %16 = sbr.rel (!%p14_p9) target bundleno = 5 (0x5), region = 69 }
  0xf1   :  { %448 = vsyncpa [#allocation3], 1 }
  0xf2   :  { %450 = vsyncpa [#allocation3 + $0x1], 1 }
  0xf3   :  { %451 = vsyncpa [#allocation4], 1 }
  0xf4   :  { %453 = vsyncpa [#allocation4 + $0x1], 1 }

</bundles_post_ra>
